<compile_context>
chip_gen: v6e
topology: v6e:2x2x1
jax: 0.10.0
libtpu: 0.0.40
codegen_flags: <defaults>
</compile_context>

<pallas_src>
import jax
import jax.numpy as jnp
from jax.experimental import pallas as pl
from jax.experimental.pallas import tpu as pltpu

BN_EPS = 1e-5
NEG_SLOPE = 0.01          # nn.LeakyReLU default
_LANE = 128
_SUBLANE = 8
_DEFAULT_ROW_TILE = 512   # rows per tile; fits comfortably in v7x's 32 MiB scoped VMEM


def _round_up(x, m):
    return (x + m - 1) // m * m


def _make_kernel(n_node, n_edge, tile_n):
    """Kernel factory (closes over static per-path valid row counts and tile size)."""

    def kernel(x_ref, w_ref, g_ref, bt_ref, o_ref,
               sum_ref, sumsq_ref, scale_ref, shift_ref):
        path = pl.program_id(0)       # 0 = node path, 1 = edge path
        phase = pl.program_id(1)      # 0 = accumulate batch stats, 1 = normalize + write
        tile = pl.program_id(2)       # row tile index
        last_tile = pl.num_programs(2) - 1

        n_valid = jnp.where(path == 0, n_node, n_edge)    # valid rows of this path
        tile_has_rows = (tile * tile_n) < n_valid          # any real rows in this tile?

        @pl.when(jnp.logical_and(phase == 0, tile == 0))
        def _init_stats():
            sum_ref[...] = jnp.zeros_like(sum_ref)
            sumsq_ref[...] = jnp.zeros_like(sumsq_ref)

        @pl.when(jnp.logical_and(phase == 0, tile_has_rows))
        def _accumulate():
            # Linear (bias-free; see header note): bf16 operands on the MXU, f32 accum.
            # Zero-padded rows of x contribute exactly zero, so no row mask is needed.
            xw = jnp.dot(x_ref[...], w_ref[...], preferred_element_type=jnp.float32)
            sum_ref[...] += jnp.sum(xw, axis=0, keepdims=True)
            sumsq_ref[...] += jnp.sum(xw * xw, axis=0, keepdims=True)

        @pl.when(jnp.logical_and(phase == 0, tile == last_tile))
        def _finalize_stats():
            # Train-mode BatchNorm1d: biased variance over the (unpadded) batch.
            inv_n = 1.0 / n_valid.astype(jnp.float32)
            mean = sum_ref[...] * inv_n
            var = jnp.maximum(sumsq_ref[...] * inv_n - mean * mean, 0.0)
            inv_std = jax.lax.rsqrt(var + BN_EPS)           # EUP, effectively free
            scale = g_ref[...].astype(jnp.float32) * inv_std
            scale_ref[...] = scale
            # Linear bias cancels exactly under train-mode BN, so shift needs only beta,
            # mean(xw) and scale.
            shift_ref[...] = bt_ref[...].astype(jnp.float32) - mean * scale

        @pl.when(jnp.logical_and(phase == 1, tile_has_rows))
        def _apply():
            xw = jnp.dot(x_ref[...], w_ref[...], preferred_element_type=jnp.float32)
            z = xw * scale_ref[...] + shift_ref[...]         # BN folded to a single FMA
            o_ref[...] = jnp.where(z >= 0, z, NEG_SLOPE * z).astype(o_ref.dtype)

        @pl.when(jnp.logical_and(phase == 1, jnp.logical_not(tile_has_rows)))
        def _zero_fill():
            # Tile lies entirely in the row padding of this path: deterministic zeros
            # (sliced away by the wrapper); skips the MXU work entirely.
            o_ref[...] = jnp.zeros_like(o_ref)

    return kernel


def _fused_embed_bn_lrelu(x_stack, w_stack, g_stack, beta_stack,
                          n_node, n_edge, tile_n):
    """x_stack: (2, n_pad, d_in_pad) bf16; w_stack: (2, d_in_pad, d_out_pad) bf16;
    gamma/beta: (2, 1, d_out_pad) f32.  Returns (2, n_pad, d_out_pad) f32."""
    n_paths, n_pad, d_in_pad = x_stack.shape
    d_out_pad = w_stack.shape[2]
    n_tiles = n_pad // tile_n
    grid = (n_paths, 2, n_tiles)

    flops = int(2 * n_paths * 2 * n_pad * d_in_pad * d_out_pad)     # matmul x2 phases
    bytes_accessed = int(2 * x_stack.size * x_stack.dtype.itemsize  # x read per phase
                         + w_stack.size * w_stack.dtype.itemsize
                         + n_paths * n_pad * d_out_pad * 4          # output write
                         + 2 * n_paths * d_out_pad * 4)             # gamma/beta

    kernel = _make_kernel(n_node, n_edge, tile_n)

    return pl.pallas_call(
        kernel,
        out_shape=jax.ShapeDtypeStruct((n_paths, n_pad, d_out_pad), jnp.float32),
        grid_spec=pltpu.PrefetchScalarGridSpec(
            num_scalar_prefetch=0,
            grid=grid,
            in_specs=[
                # x: row tile of the current path
                pl.BlockSpec((None, tile_n, d_in_pad), lambda p, ph, t: (p, t, 0)),
                # weights / gamma / beta of the current path (resident across tiles)
                pl.BlockSpec((None, d_in_pad, d_out_pad), lambda p, ph, t: (p, 0, 0)),
                pl.BlockSpec((None, 1, d_out_pad), lambda p, ph, t: (p, 0, 0)),
                pl.BlockSpec((None, 1, d_out_pad), lambda p, ph, t: (p, 0, 0)),
            ],
            # Phase 0 keeps the output block index pinned at 0 (no writebacks during the
            # stats pass); phase 1 walks the row tiles and writes the real result.
            out_specs=pl.BlockSpec((None, tile_n, d_out_pad),
                                   lambda p, ph, t: (p, ph * t, 0)),
            scratch_shapes=[pltpu.VMEM((1, d_out_pad), jnp.float32) for _ in range(4)],
        ),
        compiler_params=pltpu.CompilerParams(
            # path axis "parallel" -> the two embedding paths land on the 2 TCs on v7x;
            # phase/tile axes carry the stats dependency -> "arbitrary".
            dimension_semantics=("parallel", "arbitrary", "arbitrary"),
            vmem_limit_bytes=32 * 1024 * 1024,
        ),
        cost_estimate=pl.CostEstimate(
            flops=flops,
            transcendentals=int(2 * d_out_pad),
            bytes_accessed=bytes_accessed,
        ),
    )(x_stack, w_stack, g_stack, beta_stack)


class ResNetEmbeddingPallas:
    """JAX/Pallas port of the PyTorch ResNetEmbedding module (train-mode BN forward)."""

    def __init__(self, node_input_dim, edge_input_dim, out_dim, key):
        self.node_input_dim = node_input_dim
        self.edge_input_dim = edge_input_dim
        self.out_dim = out_dim
        self.d_in_pad = _round_up(max(node_input_dim, edge_input_dim), _LANE)
        self.d_out_pad = _round_up(out_dim, _LANE)

        ks = jax.random.split(key, 4)

        def lin_init(kw, kb, fan_in, fan_out):
            # mimic nn.Linear's uniform(-1/sqrt(fan_in), 1/sqrt(fan_in))
            bound = 1.0 / float(fan_in) ** 0.5
            w = jax.random.uniform(kw, (fan_out, fan_in), jnp.float32, -bound, bound)
            b = jax.random.uniform(kb, (fan_out,), jnp.float32, -bound, bound)
            return w, b

        # PyTorch-layout parameters (kept in f32 for the reference check).
        self.node_w, self.node_b = lin_init(ks[0], ks[1], node_input_dim, out_dim)
        self.edge_w, self.edge_b = lin_init(ks[2], ks[3], edge_input_dim, out_dim)
        self.node_gamma = jnp.ones((out_dim,), jnp.float32)
        self.node_beta = jnp.zeros((out_dim,), jnp.float32)
        self.edge_gamma = jnp.ones((out_dim,), jnp.float32)
        self.edge_beta = jnp.zeros((out_dim,), jnp.float32)

        # Kernel-side parameters: transposed, padded (lane-dense), stacked ONCE here.
        # The Linear bias cancels exactly in train-mode BN, so it is not shipped to the
        # kernel at all (it is kept above only for the pure-JAX reference).
        def pad_w(w_t, d_in):
            return jnp.pad(w_t, ((0, self.d_in_pad - d_in),
                                 (0, self.d_out_pad - out_dim)))

        self.w_stack = jnp.stack([
            pad_w(self.node_w.T, node_input_dim),
            pad_w(self.edge_w.T, edge_input_dim),
        ]).astype(jnp.bfloat16)                                   # (2, d_in_pad, d_out_pad)

        def pad_v(v, fill):
            return jnp.pad(v, (0, self.d_out_pad - out_dim),
                           constant_values=fill)[None, :]

        self.g_stack = jnp.stack([pad_v(self.node_gamma, 1.0), pad_v(self.edge_gamma, 1.0)])
        self.beta_stack = jnp.stack([pad_v(self.node_beta, 0.0), pad_v(self.edge_beta, 0.0)])

    def __call__(self, node_feature, edge_feature):
        n_node = node_feature.shape[0]
        n_edge = edge_feature.shape[0]
        max_n = max(n_node, n_edge)
        tile_n = min(_DEFAULT_ROW_TILE, _round_up(max_n, _SUBLANE))
        n_pad = _round_up(max_n, tile_n)

        def pad_x(x):
            # Zero padding is load-bearing: padded rows must contribute 0 to BN sums.
            return jnp.pad(x, ((0, n_pad - x.shape[0]),
                               (0, self.d_in_pad - x.shape[1])))

        # bf16 MXU operands (halves HBM traffic and VMEM pressure).
        x_stack = jnp.stack([pad_x(node_feature),
                             pad_x(edge_feature)]).astype(jnp.bfloat16)

        out = _fused_embed_bn_lrelu(
            x_stack, self.w_stack, self.g_stack, self.beta_stack,
            n_node, n_edge, tile_n)

        node_out = out[0, :n_node, :self.out_dim]
        edge_out = out[1, :n_edge, :self.out_dim]
        return node_out, edge_out
        # TODO(synk): PyTorch's train-mode BN also updates running_mean/running_var
        # buffers (a training side effect); it does not affect the forward output.


def _reference(x, w, b, gamma, beta):
    """Plain-JAX reference; matmul operands rounded to bf16 to match the MXU path."""
    xw = jnp.dot(x.astype(jnp.bfloat16).astype(jnp.float32),
                 w.T.astype(jnp.bfloat16).astype(jnp.float32))
    y = xw + b
    mean = y.mean(axis=0, keepdims=True)
    var = y.var(axis=0, keepdims=True)            # biased (train-mode BN)
    yhat = (y - mean) * jax.lax.rsqrt(var + BN_EPS) * gamma + beta
    return jnp.where(yhat >= 0, yhat, NEG_SLOPE * yhat)


if __name__ == "__main__":
    key = jax.random.PRNGKey(0)
    k_node, k_edge, k_param = jax.random.split(key, 3)

    node_input_dim, edge_input_dim, out_dim = 16, 32, 32
    num_nodes, num_edges = 8, 16

    node_feature = jax.random.normal(k_node, (num_nodes, node_input_dim), jnp.float32)
    edge_feature = jax.random.normal(k_edge, (num_edges, edge_input_dim), jnp.float32)

    model = ResNetEmbeddingPallas(node_input_dim, edge_input_dim, out_dim, k_param)

    node_out, edge_out = model(node_feature, edge_feature)
    jax.block_until_ready((node_out, edge_out))

    node_ref = _reference(node_feature, model.node_w, model.node_b,
                          model.node_gamma, model.node_beta)
    edge_ref = _reference(edge_feature, model.edge_w, model.edge_b,
                          model.edge_gamma, model.edge_beta)

    assert node_out.shape == (num_nodes, out_dim)
    assert edge_out.shape == (num_edges, out_dim)
    assert jnp.allclose(node_out, node_ref, atol=2e-3, rtol=2e-3)
    assert jnp.allclose(edge_out, edge_ref, atol=2e-3, rtol=2e-3)

    print("KERNEL_OK")
</pallas_src>

<mosaic_0001>
module attributes {stable_mosaic.version = 11 : i64} {
  func.func @kernel(%arg0: i32, %arg1: i32, %arg2: i32, %arg3: memref<1x16x128xbf16, #tpu.memory_space<vmem>>, %arg4: memref<1x128x128xbf16, #tpu.memory_space<vmem>>, %arg5: memref<1x1x128xf32, #tpu.memory_space<vmem>>, %arg6: memref<1x1x128xf32, #tpu.memory_space<vmem>>, %arg7: memref<1x16x128xf32, #tpu.memory_space<vmem>>, %arg8: memref<1x128xf32, #tpu.memory_space<vmem>>, %arg9: memref<1x128xf32, #tpu.memory_space<vmem>>, %arg10: memref<1x128xf32, #tpu.memory_space<vmem>>, %arg11: memref<1x128xf32, #tpu.memory_space<vmem>>) attributes {dimension_semantics = [#tpu.dimension_semantics<parallel>, #tpu.dimension_semantics<arbitrary>, #tpu.dimension_semantics<arbitrary>], iteration_bounds = array<i64: 2, 2, 1>, scalar_prefetch = 0 : i64, scratch_operands = 4 : i64, tpu.core_type = #tpu.core_type<tc>, window_params = [{transform_indices = @transform_0, window_bounds = array<i64: 1, 16, 128>}, {transform_indices = @transform_1, window_bounds = array<i64: 1, 128, 128>}, {transform_indices = @transform_2, window_bounds = array<i64: 1, 1, 128>}, {transform_indices = @transform_3, window_bounds = array<i64: 1, 1, 128>}, {transform_indices = @transform_4, window_bounds = array<i64: 1, 16, 128>}]} {
    %c0_i32 = arith.constant 0 : i32
    %0 = arith.cmpi eq, %arg0, %c0_i32 : i32
    %c8_i32 = arith.constant 8 : i32
    %c16_i32 = arith.constant 16 : i32
    %1 = arith.select %0, %c8_i32, %c16_i32 : i32
    %c16_i32_0 = arith.constant 16 : i32
    %2 = arith.muli %arg2, %c16_i32_0 : i32
    %3 = arith.cmpi slt, %2, %1 : i32
    %c0_i32_1 = arith.constant 0 : i32
    %4 = arith.cmpi eq, %arg1, %c0_i32_1 : i32
    %c0_i32_2 = arith.constant 0 : i32
    %5 = arith.cmpi eq, %arg2, %c0_i32_2 : i32
    %6 = arith.andi %4, %5 : i1
    %7 = arith.extui %6 : i1 to i32
    %c0_i32_3 = arith.constant 0 : i32
    %8 = arith.cmpi ne, %7, %c0_i32_3 : i32
    scf.if %8 {
      %cst = arith.constant 0.000000e+00 : f32
      %27 = vector.broadcast %cst : f32 to vector<1x128xf32>
      %c0 = arith.constant 0 : index
      %c0_12 = arith.constant 0 : index
      %28 = vector.load %arg8[%c0, %c0_12] : memref<1x128xf32, #tpu.memory_space<vmem>>, vector<1x128xf32>
      tpu.vector_store %arg8[%c0, %c0_12], %27 {strides = array<i32>} : memref<1x128xf32, #tpu.memory_space<vmem>>, vector<1x128xf32>,
      %cst_13 = arith.constant 0.000000e+00 : f32
      %29 = vector.broadcast %cst_13 : f32 to vector<1x128xf32>
      %c0_14 = arith.constant 0 : index
      %c0_15 = arith.constant 0 : index
      %30 = vector.load %arg9[%c0_14, %c0_15] : memref<1x128xf32, #tpu.memory_space<vmem>>, vector<1x128xf32>
      tpu.vector_store %arg9[%c0_14, %c0_15], %29 {strides = array<i32>} : memref<1x128xf32, #tpu.memory_space<vmem>>, vector<1x128xf32>,
    } else {
    }
    %c0_i32_4 = arith.constant 0 : i32
    %9 = arith.cmpi eq, %arg1, %c0_i32_4 : i32
    %10 = arith.andi %9, %3 : i1
    %11 = arith.extui %10 : i1 to i32
    %c0_i32_5 = arith.constant 0 : i32
    %12 = arith.cmpi ne, %11, %c0_i32_5 : i32
    scf.if %12 {
      %c0 = arith.constant 0 : index
      %c0_12 = arith.constant 0 : index
      %c0_13 = arith.constant 0 : index
      %27 = vector.load %arg3[%c0, %c0_12, %c0_13] : memref<1x16x128xbf16, #tpu.memory_space<vmem>>, vector<1x16x128xbf16>
      %28 = vector.shape_cast %27 : vector<1x16x128xbf16> to vector<16x128xbf16>
      %c0_14 = arith.constant 0 : index
      %c0_15 = arith.constant 0 : index
      %c0_16 = arith.constant 0 : index
      %29 = vector.load %arg4[%c0_14, %c0_15, %c0_16] : memref<1x128x128xbf16, #tpu.memory_space<vmem>>, vector<1x128x128xbf16>
      %30 = vector.shape_cast %29 : vector<1x128x128xbf16> to vector<128x128xbf16>
      %cst = arith.constant dense<0.000000e+00> : vector<16x128xf32>
      %31 = tpu.matmul %28, %30, %cst {dimension_numbers = #tpu.dot_dimension_numbers<[1], [0], [0], [1], [0, 0, 1, 1], [], []>} : vector<16x128xbf16>, vector<128x128xbf16>, vector<16x128xf32> -> vector<16x128xf32>
      %c0_17 = arith.constant 0 : index
      %c0_18 = arith.constant 0 : index
      %32 = vector.load %arg8[%c0_17, %c0_18] : memref<1x128xf32, #tpu.memory_space<vmem>>, vector<1x128xf32>
      %cst_19 = arith.constant dense<0.000000e+00> : vector<128xf32>
      %33 = vector.multi_reduction <add>, %31, %cst_19 [0] : vector<16x128xf32> to vector<128xf32>
      %34 = vector.shape_cast %33 : vector<128xf32> to vector<1x128xf32>
      %35 = arith.addf %32, %34 : vector<1x128xf32>
      %c0_20 = arith.constant 0 : index
      %c0_21 = arith.constant 0 : index
      %36 = vector.load %arg8[%c0_20, %c0_21] : memref<1x128xf32, #tpu.memory_space<vmem>>, vector<1x128xf32>
      tpu.vector_store %arg8[%c0_20, %c0_21], %35 {strides = array<i32>} : memref<1x128xf32, #tpu.memory_space<vmem>>, vector<1x128xf32>,
      %c0_22 = arith.constant 0 : index
      %c0_23 = arith.constant 0 : index
      %37 = vector.load %arg9[%c0_22, %c0_23] : memref<1x128xf32, #tpu.memory_space<vmem>>, vector<1x128xf32>
      %38 = arith.mulf %31, %31 : vector<16x128xf32>
      %cst_24 = arith.constant dense<0.000000e+00> : vector<128xf32>
      %39 = vector.multi_reduction <add>, %38, %cst_24 [0] : vector<16x128xf32> to vector<128xf32>
      %40 = vector.shape_cast %39 : vector<128xf32> to vector<1x128xf32>
      %41 = arith.addf %37, %40 : vector<1x128xf32>
      %c0_25 = arith.constant 0 : index
      %c0_26 = arith.constant 0 : index
      %42 = vector.load %arg9[%c0_25, %c0_26] : memref<1x128xf32, #tpu.memory_space<vmem>>, vector<1x128xf32>
      tpu.vector_store %arg9[%c0_25, %c0_26], %41 {strides = array<i32>} : memref<1x128xf32, #tpu.memory_space<vmem>>, vector<1x128xf32>,
    } else {
    }
    %c0_i32_6 = arith.constant 0 : i32
    %13 = arith.cmpi eq, %arg1, %c0_i32_6 : i32
    %c0_i32_7 = arith.constant 0 : i32
    %14 = arith.cmpi eq, %arg2, %c0_i32_7 : i32
    %15 = arith.andi %13, %14 : i1
    %16 = arith.extui %15 : i1 to i32
    %c0_i32_8 = arith.constant 0 : i32
    %17 = arith.cmpi ne, %16, %c0_i32_8 : i32
    scf.if %17 {
      %27 = arith.sitofp %1 : i32 to f32
      %cst = arith.constant 1.000000e+00 : f32
      %28 = arith.divf %cst, %27 : f32
      %c0 = arith.constant 0 : index
      %c0_12 = arith.constant 0 : index
      %29 = vector.load %arg8[%c0, %c0_12] : memref<1x128xf32, #tpu.memory_space<vmem>>, vector<1x128xf32>
      %30 = vector.broadcast %28 : f32 to vector<1x128xf32>
      %31 = arith.mulf %29, %30 : vector<1x128xf32>
      %c0_13 = arith.constant 0 : index
      %c0_14 = arith.constant 0 : index
      %32 = vector.load %arg9[%c0_13, %c0_14] : memref<1x128xf32, #tpu.memory_space<vmem>>, vector<1x128xf32>
      %33 = vector.broadcast %28 : f32 to vector<1x128xf32>
      %34 = arith.mulf %32, %33 : vector<1x128xf32>
      %35 = arith.mulf %31, %31 : vector<1x128xf32>
      %36 = arith.subf %34, %35 : vector<1x128xf32>
      %cst_15 = arith.constant 0.000000e+00 : f32
      %37 = vector.broadcast %cst_15 : f32 to vector<1x128xf32>
      %38 = arith.maximumf %36, %37 : vector<1x128xf32>
      %cst_16 = arith.constant 9.99999974E-6 : f32
      %39 = vector.broadcast %cst_16 : f32 to vector<1x128xf32>
      %40 = arith.addf %38, %39 : vector<1x128xf32>
      %41 = math.rsqrt %40 : vector<1x128xf32>
      %c0_17 = arith.constant 0 : index
      %c0_18 = arith.constant 0 : index
      %c0_19 = arith.constant 0 : index
      %42 = vector.load %arg5[%c0_17, %c0_18, %c0_19] : memref<1x1x128xf32, #tpu.memory_space<vmem>>, vector<1x1x128xf32>
      %43 = vector.shape_cast %42 : vector<1x1x128xf32> to vector<1x128xf32>
      %44 = arith.mulf %43, %41 : vector<1x128xf32>
      %c0_20 = arith.constant 0 : index
      %c0_21 = arith.constant 0 : index
      %45 = vector.load %arg10[%c0_20, %c0_21] : memref<1x128xf32, #tpu.memory_space<vmem>>, vector<1x128xf32>
      tpu.vector_store %arg10[%c0_20, %c0_21], %44 {strides = array<i32>} : memref<1x128xf32, #tpu.memory_space<vmem>>, vector<1x128xf32>,
      %c0_22 = arith.constant 0 : index
      %c0_23 = arith.constant 0 : index
      %c0_24 = arith.constant 0 : index
      %46 = vector.load %arg6[%c0_22, %c0_23, %c0_24] : memref<1x1x128xf32, #tpu.memory_space<vmem>>, vector<1x1x128xf32>
      %47 = vector.shape_cast %46 : vector<1x1x128xf32> to vector<1x128xf32>
      %48 = arith.mulf %31, %44 : vector<1x128xf32>
      %49 = arith.subf %47, %48 : vector<1x128xf32>
      %c0_25 = arith.constant 0 : index
      %c0_26 = arith.constant 0 : index
      %50 = vector.load %arg11[%c0_25, %c0_26] : memref<1x128xf32, #tpu.memory_space<vmem>>, vector<1x128xf32>
      tpu.vector_store %arg11[%c0_25, %c0_26], %49 {strides = array<i32>} : memref<1x128xf32, #tpu.memory_space<vmem>>, vector<1x128xf32>,
    } else {
    }
    %c1_i32 = arith.constant 1 : i32
    %18 = arith.cmpi eq, %arg1, %c1_i32 : i32
    %19 = arith.andi %18, %3 : i1
    %20 = arith.extui %19 : i1 to i32
    %c0_i32_9 = arith.constant 0 : i32
    %21 = arith.cmpi ne, %20, %c0_i32_9 : i32
    scf.if %21 {
      %c0 = arith.constant 0 : index
      %c0_12 = arith.constant 0 : index
      %c0_13 = arith.constant 0 : index
      %27 = vector.load %arg3[%c0, %c0_12, %c0_13] : memref<1x16x128xbf16, #tpu.memory_space<vmem>>, vector<1x16x128xbf16>
      %28 = vector.shape_cast %27 : vector<1x16x128xbf16> to vector<16x128xbf16>
      %c0_14 = arith.constant 0 : index
      %c0_15 = arith.constant 0 : index
      %c0_16 = arith.constant 0 : index
      %29 = vector.load %arg4[%c0_14, %c0_15, %c0_16] : memref<1x128x128xbf16, #tpu.memory_space<vmem>>, vector<1x128x128xbf16>
      %30 = vector.shape_cast %29 : vector<1x128x128xbf16> to vector<128x128xbf16>
      %cst = arith.constant dense<0.000000e+00> : vector<16x128xf32>
      %31 = tpu.matmul %28, %30, %cst {dimension_numbers = #tpu.dot_dimension_numbers<[1], [0], [0], [1], [0, 0, 1, 1], [], []>} : vector<16x128xbf16>, vector<128x128xbf16>, vector<16x128xf32> -> vector<16x128xf32>
      %c0_17 = arith.constant 0 : index
      %c0_18 = arith.constant 0 : index
      %32 = vector.load %arg10[%c0_17, %c0_18] : memref<1x128xf32, #tpu.memory_space<vmem>>, vector<1x128xf32>
      %33 = vector.broadcast %32 : vector<1x128xf32> to vector<16x128xf32>
      %34 = arith.mulf %31, %33 : vector<16x128xf32>
      %c0_19 = arith.constant 0 : index
      %c0_20 = arith.constant 0 : index
      %35 = vector.load %arg11[%c0_19, %c0_20] : memref<1x128xf32, #tpu.memory_space<vmem>>, vector<1x128xf32>
      %36 = vector.broadcast %35 : vector<1x128xf32> to vector<16x128xf32>
      %37 = arith.addf %34, %36 : vector<16x128xf32>
      %cst_21 = arith.constant 0.000000e+00 : f32
      %38 = vector.broadcast %cst_21 : f32 to vector<16x128xf32>
      %39 = arith.cmpf oge, %37, %38 : vector<16x128xf32>
      %cst_22 = arith.constant 0.00999999977 : f32
      %40 = vector.broadcast %cst_22 : f32 to vector<16x128xf32>
      %41 = arith.mulf %40, %37 : vector<16x128xf32>
      %42 = arith.select %39, %37, %41 : vector<16x128xi1>, vector<16x128xf32>
      %c0_23 = arith.constant 0 : index
      %c0_24 = arith.constant 0 : index
      %c0_25 = arith.constant 0 : index
      %43 = vector.load %arg7[%c0_23, %c0_24, %c0_25] : memref<1x16x128xf32, #tpu.memory_space<vmem>>, vector<1x16x128xf32>
      %44 = vector.shape_cast %43 : vector<1x16x128xf32> to vector<16x128xf32>
      %45 = vector.shape_cast %42 : vector<16x128xf32> to vector<1x16x128xf32>
      tpu.vector_store %arg7[%c0_23, %c0_24, %c0_25], %45 {strides = array<i32>} : memref<1x16x128xf32, #tpu.memory_space<vmem>>, vector<1x16x128xf32>,
    } else {
    }
    %c1_i32_10 = arith.constant 1 : i32
    %22 = arith.cmpi eq, %arg1, %c1_i32_10 : i32
    %true = arith.constant true
    %23 = arith.xori %3, %true : i1
    %24 = arith.andi %22, %23 : i1
    %25 = arith.extui %24 : i1 to i32
    %c0_i32_11 = arith.constant 0 : i32
    %26 = arith.cmpi ne, %25, %c0_i32_11 : i32
    scf.if %26 {
      %cst = arith.constant 0.000000e+00 : f32
      %27 = vector.broadcast %cst : f32 to vector<16x128xf32>
      %c0 = arith.constant 0 : index
      %c0_12 = arith.constant 0 : index
      %c0_13 = arith.constant 0 : index
      %28 = vector.load %arg7[%c0, %c0_12, %c0_13] : memref<1x16x128xf32, #tpu.memory_space<vmem>>, vector<1x16x128xf32>
      %29 = vector.shape_cast %28 : vector<1x16x128xf32> to vector<16x128xf32>
      %30 = vector.shape_cast %27 : vector<16x128xf32> to vector<1x16x128xf32>
      tpu.vector_store %arg7[%c0, %c0_12, %c0_13], %30 {strides = array<i32>} : memref<1x16x128xf32, #tpu.memory_space<vmem>>, vector<1x16x128xf32>,
    } else {
    }
    return
  }
  func.func @transform_0(%arg0: i32, %arg1: i32, %arg2: i32) -> (i32, i32, i32) {
    %c0_i32 = arith.constant 0 : i32
    %c0_i32_0 = arith.constant 0 : i32
    return %arg0, %arg2, %c0_i32 : i32, i32, i32
  }
  func.func @transform_1(%arg0: i32, %arg1: i32, %arg2: i32) -> (i32, i32, i32) {
    %c0_i32 = arith.constant 0 : i32
    %c0_i32_0 = arith.constant 0 : i32
    %c0_i32_1 = arith.constant 0 : i32
    return %arg0, %c0_i32, %c0_i32_0 : i32, i32, i32
  }
  func.func @transform_2(%arg0: i32, %arg1: i32, %arg2: i32) -> (i32, i32, i32) {
    %c0_i32 = arith.constant 0 : i32
    %c0_i32_0 = arith.constant 0 : i32
    %c0_i32_1 = arith.constant 0 : i32
    return %arg0, %c0_i32, %c0_i32_0 : i32, i32, i32
  }
  func.func @transform_3(%arg0: i32, %arg1: i32, %arg2: i32) -> (i32, i32, i32) {
    %c0_i32 = arith.constant 0 : i32
    %c0_i32_0 = arith.constant 0 : i32
    %c0_i32_1 = arith.constant 0 : i32
    return %arg0, %c0_i32, %c0_i32_0 : i32, i32, i32
  }
  func.func @transform_4(%arg0: i32, %arg1: i32, %arg2: i32) -> (i32, i32, i32) {
    %0 = arith.muli %arg1, %arg2 : i32
    %c0_i32 = arith.constant 0 : i32
    %c0_i32_0 = arith.constant 0 : i32
    return %arg0, %0, %c0_i32 : i32, i32, i32
  }
}

</mosaic_0001>

<bundles_post_ra>
// kernel: tpu_custom_call.1
= control target key start
LH: loop header
LB: loop body
LE: loop exit
PB: predicated region body
PF: predicated region fallthrough
CT: control target
= control target key end

     0   :  { %s1467_s0 = inlined_call_operand.hbm [shape: bf16[2,16,128], index: 0, kind: input, shape index: {}]   ;;  %s1468_s1 = inlined_call_operand.hbm [shape: bf16[2,128,128], index: 1, kind: input, shape index: {}]   ;;  %s1469_s2 = inlined_call_operand.vmem [shape: f32[2,1,128], index: 2, kind: input, shape index: {}]   ;;  %s1470_s3 = inlined_call_operand.vmem [shape: f32[2,1,128], index: 3, kind: input, shape index: {}]   ;;  %s1471_s4 = inlined_call_operand.hbm [shape: f32[2,16,128], index: 4, kind: output, shape index: {}]  }
   0x1   :  { %1474 = sst [smem:[#allocation19_spill]] %s1467_s0 }
   0x2   :  { %9 = vsyncpa [#allocation7], 0 }
   0x3   :  { %11 = vsyncpa [#allocation7 + $0x1], 0 }
   0x4   :  { %12 = vsyncpa [#allocation10], 0 }
   0x5   :  { %14 = vsyncpa [#allocation10 + $0x1], 0 }
   0x6   :  { %15 = vsyncpa [#allocation8], 0 }
   0x7   :  { %17 = vsyncpa [#allocation8 + $0x1], 0  ;;  %s1211_s15 = smov 0   ;;  %s1213_s16 = smov 0  }
   0x8   :  { %s1215_s17 = smov 0   ;;  %s1217_s18 = smov 0  }
   0x9   :  { %s1219_s19 = smov 0   ;;  %s1221_s20 = smov 0  }
   0xa   :  { %s1223_s21 = smov 0   ;;  %s1225_s22 = smov 0  }
   0xb LB: > { %1475 = sst [smem:[#allocation15_spill]] %s1164_s20  ;;  %s791_s23 = sadd.s32 4294967295, %s1172_s22   ;;  %s1172_s22 = sphi %s1225_s22, %s23_s22   ;;  %s1168_s21 = sphi %s1223_s21, %s1494_s21   ;;  %s1164_s20 = sphi %s1221_s20, %s1488_s20   ;;  %s1160_s19 = sphi %s1219_s19, %s1493_s19   ;;  %s1156_s18 = sphi %s1217_s18, %s1487_s18   ;;  %s1152_s17 = sphi %s1215_s17, %s1492_s17   ;;  %s1148_s16 = sphi %s1213_s16, %s1491_s16   ;;  %s1144_s15 = sphi %s1211_s15, %s1490_s15  }
   0xc   : > { %s792_s24 = sadd.s32 4294967294, %s1172_s22   ;;  %s38_s25 = sadd.s32 1, %s1164_s20 }
   0xd   : > { %s42_s26 = sadd.s32 1, %s1168_s21  ;;  %p40_p0 = scmp.ge.s32.totalorder %s38_s25, 2 }
   0xe   : > { %s51_s27 = sadd.s32 1, %s1152_s17  ;;  %p58_p1 = scmp.ne.s32.totalorder %s1152_s17, %s1148_s16 }
   0xf   : > { %p59_p2 = scmp.eq.s32.totalorder %s1172_s22, 0  ;;  %s1496_s25 = smov (%p40_p0, %s38_s25), 0 }
  0x10   : > { %1476 = sst [smem:[#allocation16_spill]] %s1496_s25  ;;  %s1498_s26 = smov (!%p40_p0, %s42_s26), %s1168_s21 }
  0x11   : > { %p1262_p3 = por %p59_p2, %p58_p1  ;;  %p64_p4 = scmp.ne.s32.totalorder %s1148_s16, %s1144_s15 }
  0x12   : > { %p44_p5 = scmp.ge.s32.totalorder %s1498_s26, 2  ;;  %p65_p6 = scmp.eq.s32.totalorder %s791_s23, 0 }
  0x13   : > { %p170_p7 = scmp.eq.s32.totalorder %s791_s23, 3  ;;  %p176_p8 = scmp.eq.s32.totalorder %s792_s24, 3 }
  0x14   : > { %s1500_s26 = smov (%p44_p5, %s1498_s26), 0  ;;  %p1270_p9 = por %p65_p6, %p64_p4 }
  0x15   : > { %1478 = sst [smem:[#allocation17_spill]] %s1500_s26  ;;  %p1274_p10 = por %p170_p7, %p58_p1 }
  0x16   : > { %s46_s5 = ssub.s32 %s1168_s21, %s1500_s26  ;;  %p1280_p11 = por %p176_p8, %p64_p4 }
  0x17   : > { %p49_p12 = scmp.eq.s32.totalorder %s46_s5, 0  ;;  %p914_p13 = scmp.lt.s32.totalorder %s1172_s22, 4 }
  0x18   : > { %s1286_s7 = sand.u32 1, %s1152_s17   ;;  %s833_s10 = sshll.u32 %s1168_s21, 7 }
  0x19   : > { %s1289_s8 = scalar_select %p49_p12, %s1152_s17, %s51_s27  }
  0x1a   : > { %s795_s9 = sshll.u32 %s1286_s7, 3  ;;  %s1483_s0 = sld [smem:[#allocation19_spill]] }
  0x1b   : > { %1482 = sst [smem:[#allocation18_spill]] %s1289_s8  ;;  %s200_s14 = scalar_lea.vmem [#allocation6], %s795_s9 }
  0x1c   : > { %s209_s23 = sshll.u32 %s200_s14, 4  ;;  %p1298_p0 = pnand %p914_p13, %p1262_p3  ;;  %s210_s23 = int_to_ptr.vmem [resolvable:$true] %s209_s23 }
  0x1d   : > { %p801_p1 = scmp.ge.s32.totalorder %s1172_s22, 1  ;;  %s197_s5 = scalar_lea.sflag [#allocation7], %s1286_s7 }
  0x1e   : > { %p1016_p2 = pneg %p1298_p0  ;;  %s1027_s27 = scalar_lea.vmem %s210_s23, 128 }
  0x1f   : > { %p1028_p4 = scmp.ne.s32.totalorder %s210_s23, %s1027_s27  ;;  %s1174_s9 = smov [#allocation6]  }
  0x20   : > { %s208_s13 = scalar_lea.hbm %s1483_s0, %s833_s10  ;;  %s1032_s10 = sshll.u32 %s1174_s9, 4  ;;  %s1033_s10 = int_to_ptr.vmem [resolvable:$false] %s1032_s10 }
  0x21   : > { %p1030_p5 = pnand %p1028_p4, %p1016_p2  ;;  %s1034_s28 = scalar_lea.vmem %s1033_s10, 256 }
  0x22   : > { %p1035_p3 = scmp.lt.s32.totalorder %s210_s23, %s1033_s10  ;;  %p1036_p7 = scmp.lt.s32.totalorder %s1034_s28, %s1027_s27 }
  0x23   : > { %p1031_p6 = pneg %p1030_p5 }
  0x24   : > { %p1037_p8 = por %p1036_p7, %p1035_p3 }
  0x26   : > { %p1038_p12 = pnand %p1037_p8, %p1031_p6 }
  0x28   : > { %1041 = shalt.err (!%p1038_p12)
}
  0x29   : > { %s1175_s11 = smov 64   ;;  %s1176_s12 = smov 4  }
  0x2a   : > { %906 = dma.hbm_to_vmem [thread:$0]  (!%p1298_p0), %s208_s13, 128, %s210_s23, %s197_s5, %s1175_s11, %s1175_s11, %s1176_s12  }
  0x2b   : > { %p250_p13 = scmp.lt.s32.totalorder %s1172_s22, 5  ;;  %s798_s14 = sshll.u32 %s1286_s7, 6 }
  0x2c   : > { %s834_s9 = sshll.u32 %s1168_s21, 10  ;;  %s223_s26 = scalar_lea.vmem [#allocation9], %s798_s14 }
  0x2d   : > { %p1316_p4 = pnand %p801_p1, %p250_p13  ;;  %s229_s0 = scalar_lea.hbm %s1468_s1, %s834_s9 }
  0x2e   : > { %s230_s25 = sshll.u32 %s223_s26, 4  ;;  %s220_s20 = scalar_lea.sflag [#allocation10], %s1286_s7  ;;  %s231_s25 = int_to_ptr.vmem [resolvable:$true] %s230_s25 }
  0x2f   : > { %s1055_s8 = scalar_lea.vmem %s231_s25, 1024  ;;  %s1177_s13 = smov [#allocation9]  }
  0x30   : > { %p1056_p5 = scmp.ne.s32.totalorder %s231_s25, %s1055_s8  ;;  %s1060_s23 = sshll.u32 %s1177_s13, 4  ;;  %s1061_s23 = int_to_ptr.vmem [resolvable:$false] %s1060_s23 }
  0x31   : > { %s1062_s5 = scalar_lea.vmem %s1061_s23, 2048  ;;  %p1063_p1 = scmp.lt.s32.totalorder %s231_s25, %s1061_s23 }
  0x32   : > { %p1058_p6 = pnand %p1056_p5, %p1016_p2  ;;  %p1064_p7 = scmp.lt.s32.totalorder %s1062_s5, %s1055_s8 }
  0x34   : > { %p1059_p3 = pneg %p1058_p6  ;;  %p1065_p8 = por %p1064_p7, %p1063_p1 }
  0x36   : > { %p1066_p12 = pnand %p1065_p8, %p1059_p3 }
  0x38   : > { %1069 = shalt.err (!%p1066_p12)
}
  0x39   : > { %909 = dma.hbm_to_vmem [thread:$0]  (!%p1298_p0), %s229_s0, 1024, %s231_s25, %s220_s20, %s1175_s11, %s1175_s11, %s1176_s12  }
  0x3a   : > { %254 = sbr.rel (%p1316_p4) target bundleno = 688 (0x2b0), region = 36  ;;  %s1332_s26 = sand.u32 (!%p1316_p4), 1, %s1148_s16  }
  0x3b   : > { %s802_s7 = sshll.u32 (!%p1316_p4), %s1332_s26, 3  ;;  %s257_s14 = scalar_lea.sflag (!%p1316_p4), [#allocation7], %s1332_s26 }
  0x3c   : > { %s1336_s9 = scalar_lea.vmem (!%p1316_p4), [#allocation6], %s802_s7 }
  0x3f   : > { %1129 = dma.done.wait (%p1270_p9), %s257_s14, 128  }
  0x40   : > { %1131 = vsyncadd (%p1270_p9), %s257_s14, 4294967168  ;;  %s803_s0 = sshll.u32 %s1332_s26, 6  ;;  %s266_s20 = scalar_lea.sflag [#allocation10], %s1332_s26 }
  0x41   : > { %s1344_s25 = scalar_lea.vmem [#allocation9], %s803_s0 }
  0x42   : > { %1133 = dma.done.wait (%p1270_p9), %s266_s20, 1024  }
  0x43   : > { %1135 = vsyncadd (%p1270_p9), %s266_s20, 4294966272  ;;  %s804_s8 = sshll.u32 %s1332_s26, 4  ;;  %p306_p0 = scmp.lt.s32.totalorder %s1160_s19, 1 }
  0x44   : > { %p315_p2 = scmp.eq.s32.totalorder %s1160_s19, 0  ;;  %p319_p9 = scmp.eq.s32.totalorder %s1156_s18, 0 }
  0x45   : > { %s1354_s24 = scalar_select %p306_p0, %s1160_s19, 1  ;;  %v1178_v0 = vmov (%p319_p9), 0.0  }
  0x46   : > { %s1356_s11 = scalar_select %p315_p2, 8, 16  ;;  %325 = vst [vmem:[#allocation2] sm:$0x1] (%p319_p9), %v1178_v0  ;;  %326 = vst [vmem:[#allocation3] sm:$0x1] (%p319_p9), %v1178_v0 }
  0x47   : > { %s308_s10 = scalar_lea.vmem %s1469_s2, %s1354_s24  ;;  %s311_s13 = scalar_lea.vmem %s1470_s3, %s1354_s24 }
  0x48   : > { %s1367_s23 = scalar_lea.vmem [#allocation11], %s804_s8  ;;  %324 = sbr.rel (!%p319_p9) target bundleno = 77 (0x4d), region = 48 }
  0x4d PF: > { %330 = sbr.rel (!%p319_p9) target bundleno = 326 (0x146), region = 52  ;;  %v990_v1 = vld [vmem:[%s1344_s25 + $0x38] sm:$0xff] (%p319_p9)   ;;  %v1179_v2 = vmov (%p319_p9), 0.0   ;;  %v991_v3 = vld [vmem:[%s1344_s25 + $0x30] sm:$0xff] (%p319_p9)   ;;  %vm1180_vm0 = vmmov (%p319_p9), 0   ;;  %v992_v4 = vld [vmem:[%s1344_s25 + $0x28] sm:$0xff] (%p319_p9)  }
  0x4e   : > { %855 = vmatprep.subr.bf16.mxu0 (%p319_p9), %v1179_v2  ;;  %871 = vmatprep.mubr.msk.bf16.mxu0 (%p319_p9), %vm1180_vm0, %v1179_v2  ;;  %v993_v5 = vld [vmem:[%s1344_s25 + $0x20] sm:$0xff] (%p319_p9)   ;;  %v994_v6 = vld [vmem:[%s1344_s25 + $0x18] sm:$0xff] (%p319_p9)   ;;  %v995_v7 = vld [vmem:[%s1344_s25 + $0x10] sm:$0xff] (%p319_p9)  }
  0x4f   : > { %856 = vmatpush3.bf16.msra.mxu0 (%p319_p9), %v990_v1  ;;  %v996_v8 = vld [vmem:[%s1344_s25 + $0x8] sm:$0xff] (%p319_p9)   ;;  %v997_v9 = vld [vmem:[%s1344_s25] sm:$0xff] (%p319_p9)   ;;  %v998_v10 = vld [vmem:[%s1336_s9] sm:$0xff] (%p319_p9)  }
  0x50   : > { %857 = vmatprep.subr.bf16.mxu0 (%p319_p9), %v1179_v2  ;;  %v444_v28 = vld [vmem:[#allocation2] sm:$0x1] (%p319_p9)  ;;  %v454_v31 = vld [vmem:[#allocation3] sm:$0x1] (%p319_p9) }
  0x53   : > { %858 = vmatpush3.bf16.msra.mxu0 %v991_v3 }
  0x54   : > { %859 = vmatprep.subr.bf16.mxu0 %v1179_v2 }
  0x57   : > { %860 = vmatpush3.bf16.msra.mxu0 %v992_v4 }
  0x58   : > { %861 = vmatprep.subr.bf16.mxu0 %v1179_v2 }
  0x5b   : > { %862 = vmatpush3.bf16.msra.mxu0 %v993_v5 }
  0x5c   : > { %863 = vmatprep.subr.bf16.mxu0 %v1179_v2 }
  0x5f   : > { %864 = vmatpush3.bf16.msra.mxu0 %v994_v6 }
  0x60   : > { %865 = vmatprep.subr.bf16.mxu0 %v1179_v2 }
  0x63   : > { %866 = vmatpush3.bf16.msra.mxu0 %v995_v7 }
  0x64   : > { %867 = vmatprep.subr.bf16.mxu0 %v1179_v2 }
  0x67   : > { %868 = vmatpush3.bf16.msra.mxu0 %v996_v8 }
  0x68   : > { %869 = vmatprep.subr.bf16.mxu0 %v1179_v2 }
  0x6b   : > { %870 = vmatpush3.bf16.msra.mxu0 %v997_v9 }
  0x6e   : > { %872 = vmatmul.mubr.bf16.vlgmr.msra.gmra.mxu0 %v998_v10 }
 0x12e   : > { %v437_v11 = vpop.f32.mrf.mxu0 }
 0x12f   : > { %v455_v14 = vmul.f32 %v437_v11, %v437_v11 }
 0x130   : > { %v873_v12 = vpop.f32.mrf.mxu0 }
 0x132   : > { %v440_v13 = vpop.f32.mrf.mxu0 }
 0x133   : > { %v445_v15 = vadd.f32 %v440_v13, %v437_v11  ;;  %v456_v16 = vmul.f32 %v440_v13, %v440_v13 }
 0x134   : > { %v874_v17 = vpop.f32.mrf.mxu0 }
 0x135   : > { %v446_v18 = vrot.slane %v445_v15, 4  ;;  %v457_v19 = vadd.f32 %v456_v16, %v455_v14 }
 0x137   : > { %v447_v20 = vadd.f32 %v446_v18, %v445_v15  ;;  %v458_v21 = vrot.slane %v457_v19, 4 }
 0x139   : > { %v448_v22 = vrot.slane %v447_v20, 2  ;;  %v459_v23 = vadd.f32 %v458_v21, %v457_v19 }
 0x13b   : > { %v449_v24 = vadd.f32 %v448_v22, %v447_v20  ;;  %v460_v25 = vrot.slane %v459_v23, 2 }
 0x13d   : > { %v450_v26 = vrot.slane %v449_v24, 1  ;;  %v461_v27 = vadd.f32 %v460_v25, %v459_v23 }
 0x13f   : > { %v451_v29 = vadd.f32 %v450_v26, %v449_v24  ;;  %v462_v30 = vrot.slane %v461_v27, 1 }
 0x141   : > { %v452_v32 = vadd.f32 %v451_v29, %v444_v28  ;;  %v463_v33 = vadd.f32 %v462_v30, %v461_v27 }
 0x143   : > { %453 = vst [vmem:[#allocation2] sm:$0x1] %v452_v32  ;;  %v464_v34 = vadd.f32 %v463_v33, %v454_v31 }
 0x145   : > { %465 = vst [vmem:[#allocation3] sm:$0x1] %v464_v34 }
 0x146 PF: > { %467 = sbr.rel (!%p319_p9) target bundleno = 425 (0x1a9), region = 56  ;;  %s468_s5 = scvt.s32.f32 (%p319_p9), %s1356_s11  ;;  %v482_v46 = vld [vmem:[%s308_s10] sm:$0x1] (%p319_p9) }
 0x147   : > { %v485_v49 = vld [vmem:[%s311_s13] sm:$0x1] (%p319_p9) }
 0x148   : > { %v469_v35 = vstv (%p319_p9), %s468_s5 }
 0x149   : > { %999 = vrcp.f32 (%p319_p9), %v469_v35 }
 0x14a   : > { %v472_v37 = vld [vmem:[#allocation2] sm:$0x1] (%p319_p9) }
 0x14c   : > { %v475_v39 = vld [vmem:[#allocation3] sm:$0x1] }
 0x156   : > { %v1000_v36 = vpop.eup %999 }
 0x157   : > { %895 = vpush %v1000_v36 }
 0x188   : > { %s896_s7 = spop %895 }
 0x189   : > { %v473_v38 = vstv %s896_s7 }
 0x18a   : > { %v474_v40 = vmul.f32 %v473_v38, %v472_v37  ;;  %v476_v41 = vmul.f32 %v475_v39, %v473_v38 }
 0x18c   : > { %v477_v42 = vmul.f32 %v474_v40, %v474_v40 }
 0x18e   : > { %v478_v43 = vsub.f32 %v476_v41, %v477_v42 }
 0x190   : > { %v479_v44 = vmax.f32 %v478_v43, 0.0 }
 0x192   : > { %v480_v45 = vadd.f32 1e-05, %v479_v44 }
 0x194   : > { %1001 = vrsqrt.f32 %v480_v45 }
 0x1a1   : > { %v1002_v47 = vpop.eup %1001 }
 0x1a2   : > { %v483_v48 = vmul.f32 %v1002_v47, %v482_v46 }
 0x1a4   : > { %484 = vst [vmem:[#allocation4] sm:$0x1] %v483_v48  ;;  %v486_v50 = vmul.f32 %v483_v48, %v474_v40 }
 0x1a6   : > { %v487_v51 = vsub.f32 %v485_v49, %v486_v50 }
 0x1a8   : > { %488 = vst [vmem:[#allocation5] sm:$0x1] %v487_v51 }
 0x1a9 PF: > { %p489_p13 = scmp.eq.s32.totalorder %s1156_s18, 1 }
 0x1aa   : > { %v1003_v52 = vld [vmem:[%s1344_s25 + $0x38] sm:$0xff] (%p489_p13)   ;;  %v1181_v53 = vmov (%p489_p13), 0.0   ;;  %v1004_v54 = vld [vmem:[%s1344_s25 + $0x30] sm:$0xff] (%p489_p13)   ;;  %vm1182_vm1 = vmmov (%p489_p13), 0   ;;  %v1005_v55 = vld [vmem:[%s1344_s25 + $0x28] sm:$0xff] (%p489_p13)  }
 0x1ab   : > { %493 = sbr.rel (!%p489_p13) target bundleno = 664 (0x298), region = 60  ;;  %875 = vmatprep.subr.bf16.mxu0 (%p489_p13), %v1181_v53  ;;  %891 = vmatprep.mubr.msk.bf16.mxu0 (%p489_p13), %vm1182_vm1, %v1181_v53  ;;  %v1006_v56 = vld [vmem:[%s1344_s25 + $0x20] sm:$0xff] (%p489_p13)   ;;  %v1007_v57 = vld [vmem:[%s1344_s25 + $0x18] sm:$0xff] (%p489_p13)   ;;  %v1008_v58 = vld [vmem:[%s1344_s25 + $0x10] sm:$0xff] (%p489_p13)  }
 0x1ac   : > { %876 = vmatpush3.bf16.msra.mxu0 (%p489_p13), %v1003_v52  ;;  %v1009_v59 = vld [vmem:[%s1344_s25 + $0x8] sm:$0xff] (%p489_p13)   ;;  %v1010_v60 = vld [vmem:[%s1344_s25] sm:$0xff] (%p489_p13)   ;;  %v1011_v61 = vld [vmem:[%s1336_s9] sm:$0xff] (%p489_p13)  }
 0x1ad   : > { %877 = vmatprep.subr.bf16.mxu0 (%p489_p13), %v1181_v53  ;;  %v825_v62 = vld [vmem:[#allocation4] ss:$0 sm:$0xff] (%p489_p13) }
 0x1af   : > { %v826_v0 = vld [vmem:[#allocation5] ss:$0 sm:$0xff] (%p489_p13) }
 0x1b0   : > { %878 = vmatpush3.bf16.msra.mxu0 %v1004_v54 }
 0x1b1   : > { %879 = vmatprep.subr.bf16.mxu0 %v1181_v53 }
 0x1b4   : > { %880 = vmatpush3.bf16.msra.mxu0 %v1005_v55 }
 0x1b5   : > { %881 = vmatprep.subr.bf16.mxu0 %v1181_v53 }
 0x1b8   : > { %882 = vmatpush3.bf16.msra.mxu0 %v1006_v56 }
 0x1b9   : > { %883 = vmatprep.subr.bf16.mxu0 %v1181_v53 }
 0x1bc   : > { %884 = vmatpush3.bf16.msra.mxu0 %v1007_v57 }
 0x1bd   : > { %885 = vmatprep.subr.bf16.mxu0 %v1181_v53 }
 0x1c0   : > { %886 = vmatpush3.bf16.msra.mxu0 %v1008_v58 }
 0x1c1   : > { %887 = vmatprep.subr.bf16.mxu0 %v1181_v53 }
 0x1c4   : > { %888 = vmatpush3.bf16.msra.mxu0 %v1009_v59 }
 0x1c5   : > { %889 = vmatprep.subr.bf16.mxu0 %v1181_v53 }
 0x1c8   : > { %890 = vmatpush3.bf16.msra.mxu0 %v1010_v60 }
 0x1cb   : > { %892 = vmatmul.mubr.bf16.vlgmr.msra.gmra.mxu0 %v1011_v61 }
 0x28b   : > { %v600_v63 = vpop.f32.mrf.mxu0 }
 0x28c   : > { %v614_v1 = vmul.f32 %v825_v62, %v600_v63 }
 0x28d   : > { %v893_v2 = vpop.f32.mrf.mxu0 }
 0x28e   : > { %v623_v3 = vadd.f32 %v826_v0, %v614_v1 }
 0x28f   : > { %v603_v4 = vpop.f32.mrf.mxu0 }
 0x290   : > { %vm625_vm2 = vcmp.ge.f32.partialorder %v623_v3, 0.0  ;;  %v627_v5 = vmul.f32 0.01, %v623_v3  ;;  %v615_v6 = vmul.f32 %v825_v62, %v603_v4 }
 0x291   : > { %v894_v7 = vpop.f32.mrf.mxu0 }
 0x292   : > { %v629_v8 = vsel %vm625_vm2, %v623_v3, %v627_v5  ;;  %v624_v9 = vadd.f32 %v826_v0, %v615_v6 }
 0x293   : > { %631 = vst [vmem:[%s1367_s23] sm:$0xff] %v629_v8 }
 0x294   : > { %vm626_vm3 = vcmp.ge.f32.partialorder %v624_v9, 0.0  ;;  %v628_v10 = vmul.f32 0.01, %v624_v9 }
 0x296   : > { %v630_v11 = vsel %vm626_vm3, %v624_v9, %v628_v10 }
 0x297   : > { %632 = vst [vmem:[%s1367_s23 + $0x8] sm:$0xff] %v630_v11 }
 0x298 PF: > { %s836_s18 = sshll.u32 %s1160_s19, 8  ;;  %s657_s11 = sshll.u32 %s1367_s23, 4  ;;  %s1414_s11 = int_to_ptr.vmem [resolvable:$true] %s657_s11 }
 0x299   : > { %s1411_s24 = scalar_lea.hbm %s1471_s4, %s836_s18  ;;  %s641_s12 = scalar_lea.sflag [#allocation8], %s1332_s26 }
 0x29a   : > { %s1070_s27 = scalar_lea.vmem %s1414_s11, 256  ;;  %s1183_s10 = smov [#allocation11]  }
 0x29b   : > { %p1071_p4 = scmp.ne.s32.totalorder %s1414_s11, %s1070_s27  ;;  %s1074_s29 = sshll.u32 %s1183_s10, 4  ;;  %s1075_s29 = int_to_ptr.vmem [resolvable:$false] %s1074_s29 }
 0x29c   : > { %s1076_s19 = scalar_lea.vmem %s1075_s29, 512  ;;  %p1077_p3 = scmp.lt.s32.totalorder %s1414_s11, %s1075_s29 }
 0x29d   : > { %p1072_p5 = pnand %p1071_p4, %p1274_p10  ;;  %p1078_p1 = scmp.lt.s32.totalorder %s1076_s19, %s1070_s27 }
 0x29f   : > { %p1073_p6 = pneg %p1072_p5  ;;  %p1079_p7 = por %p1078_p1, %p1077_p3 }
 0x2a1   : > { %p1080_p8 = pnand %p1079_p7, %p1073_p6 }
 0x2a3   : > { %1083 = shalt.err (!%p1080_p8)
}
 0x2a4   : > { %s1084_s28 = scalar_lea.hbm %s1411_s24, 256  ;;  %s1088_s5 = scalar_lea.hbm %s1471_s4, 512 }
 0x2a5   : > { %p1085_p12 = scmp.ne.s32.totalorder %s1411_s24, %s1084_s28  ;;  %p1089_p9 = scmp.lt.s32.totalorder %s1411_s24, %s1471_s4 }
 0x2a6   : > { %p1090_p13 = scmp.lt.s32.totalorder %s1088_s5, %s1084_s28 }
 0x2a7   : > { %p1086_p0 = pnand %p1085_p12, %p1274_p10 }
 0x2a8   : > { %p1091_p4 = por %p1090_p13, %p1089_p9 }
 0x2a9   : > { %p1087_p2 = pneg %p1086_p0 }
 0x2ab   : > { %p1092_p5 = pnand %p1091_p4, %p1087_p2 }
 0x2ad   : > { %1095 = shalt.err (!%p1092_p5)
}
 0x2ae   : > { %s1184_s0 = smov 128   ;;  %s1185_s20 = smov 8  }
 0x2af   : > { %901 = dma.vmem_to_hbm [thread:$0]  (%p1274_p10), %s1414_s11, 256, %s1411_s24, %s641_s12, %s1184_s0, %s1184_s0, %s1185_s20  }
 0x2b0 PF: > { %p915_p6 = scmp.ge.s32.totalorder %s1172_s22, 2  ;;  %s672_s8 = sand.u32 1, %s1144_s15  }
 0x2b1   : > { %s673_s18 = scalar_lea.sflag [#allocation8], %s672_s8 }
 0x2b2   : > { %p911_p3 = pnand %p915_p6, %p1280_p11 }
 0x2b4   : > { %p912_p1 = pneg %p911_p3 }
 0x2b6   : > { %1137 = dma.done.wait (%p912_p1), %s673_s18, 256  }
 0x2b7   : > { %1139 = vsyncadd (%p912_p1), %s673_s18, 4294967040  ;;  %s23_s22 = sadd.s32 1, %s1172_s22   ;;  %s1486_s30 = sld [smem:[#allocation18_spill]] }
 0x2b8   : > { %p20_p7 = scmp.ge.s32.totalorder %s23_s22, 6   ;;  %s1487_s18 = sld [smem:[#allocation15_spill]] }
 0x2b9   : > { %s1488_s20 = sld [smem:[#allocation16_spill]]  ;;  %s1490_s15 = smov %s1148_s16 }
 0x2ba   : > { %s1489_s26 = sld [smem:[#allocation17_spill]]  ;;  %s1491_s16 = smov %s1152_s17 }
 0x2bb   : > { %s1493_s19 = smov %s1168_s21 }
 0x2bc   :  { %22 = sbr.rel (!%p20_p7) target bundleno = 11 (0xb), region = 120 }
 0x2bd   : > { %s1492_s17 = smov %s1486_s30 }
 0x2c0   : > { %s1494_s21 = smov %s1489_s26 }
 0x2c1   :  { %678 = vsyncpa [#allocation7], 1 }
 0x2c2   :  { %680 = vsyncpa [#allocation7 + $0x1], 1 }
 0x2c3   :  { %681 = vsyncpa [#allocation10], 1 }
 0x2c4   :  { %683 = vsyncpa [#allocation10 + $0x1], 1 }
 0x2c5   :  { %684 = vsyncpa [#allocation8], 1 }
 0x2c6   :  { %686 = vsyncpa [#allocation8 + $0x1], 1 }

</bundles_post_ra>
